<compile_context>
chip_gen: v6e
topology: v6e:2x2x1
jax: 0.10.0
libtpu: 0.0.40
codegen_flags: <defaults>
</compile_context>

<pallas_src>
import functools
import math

import jax
import jax.numpy as jnp
from jax.experimental import pallas as pl
from jax.experimental.pallas import tpu as pltpu


def _block_budget():
    """Per-chip (target_block_bytes, vmem_limit_bytes)."""
    try:
        vmem_cap = int(pltpu.get_tpu_info().vmem_capacity_bytes)
    except Exception:
        vmem_cap = 64 * 1024 * 1024          # conservative (v7x-sized) fallback
    if vmem_cap >= (96 << 20):               # v5e / v6e: 128 MiB physical VMEM
        return 8 << 20, 64 << 20
    # v7x: 64 MiB physical VMEM per TensorCore — leave room for buffers + temporaries.
    return 6 << 20, 44 << 20


# ---------------------------------------------------------------------------
# Spatial path: x is (B, C, S) with S > 1.  Grid (batch tiles, spatial tiles).
# ---------------------------------------------------------------------------
def _hloss_spatial_kernel(x_ref, o_ref, acc_ref, *, ts, s_total, need_mask, num_j):
    # x_ref:   (bt, C, ts)  logits tile — channels on sublanes, spatial columns on lanes.
    # o_ref:   (bt, 1, 1)   per-batch-row entropy sum (written once, on the last spatial step).
    # acc_ref: (bt, 1, ts)  persistent f32 accumulator across the spatial (arbitrary) axis.
    j = pl.program_id(1)

    x = x_ref[...].astype(jnp.float32)                        # (bt, C, ts)
    m = jnp.max(x, axis=1, keepdims=True)                     # (bt, 1, ts) stable max over C
    z = x - m
    e = jnp.exp(z)
    s = jnp.sum(e, axis=1, keepdims=True)                     # (bt, 1, ts)
    ez = jnp.sum(e * z, axis=1, keepdims=True)                # (bt, 1, ts)
    # per spatial column: sum_c softmax*log_softmax = (sum_c e*z)/s - log(s)
    contrib = ez / s - jnp.log(s)                             # (bt, 1, ts)

    if need_mask:
        # Only mask the contributions (true select): padded-lane garbage stays in padded lanes.
        col = j * ts + jax.lax.broadcasted_iota(jnp.int32, (1, 1, ts), 2)
        contrib = jnp.where(col < s_total, contrib, 0.0)

    if num_j == 1:
        # Single spatial step: fold directly, skip the scratch round-trip.
        o_ref[...] = jnp.sum(contrib, axis=-1, keepdims=True)
    else:
        @pl.when(j == 0)
        def _init():
            acc_ref[...] = jnp.zeros_like(acc_ref)

        acc_ref[...] += contrib                               # pure VPU add, no relayout

        @pl.when(j == num_j - 1)
        def _fold():
            # One cross-lane reduce per batch block (not per step).
            o_ref[...] = jnp.sum(acc_ref[...], axis=-1, keepdims=True)


def _hloss_spatial(xr, target_block_bytes, vmem_limit_bytes):
    B, C, S = (int(d) for d in xr.shape)
    itemsize = jnp.dtype(xr.dtype).itemsize

    s_pad = pl.cdiv(S, 128) * 128
    # Bytes per spatial column per batch row: input column + f32 accumulator column.
    col_bytes = C * itemsize + 4
    ts = int(min(s_pad, max(128, (target_block_bytes // col_bytes) // 128 * 128)))
    per_batch_bytes = ts * col_bytes
    bt = int(max(1, min(B, target_block_bytes // per_batch_bytes)))
    # TODO(synk): tile the channel axis (two-pass online softmax over C chunks) for extreme C
    # where a single (1, C, 128) block would still exceed the VMEM limit.

    num_b = pl.cdiv(B, bt)
    num_j = pl.cdiv(S, ts)
    need_mask = (S % ts) != 0

    kernel = functools.partial(
        _hloss_spatial_kernel, ts=ts, s_total=S, need_mask=need_mask, num_j=num_j
    )

    n_elems = B * C * S
    cost = pl.CostEstimate(
        flops=8 * n_elems,
        transcendentals=n_elems + B * S,              # exp per element, log per column
        bytes_accessed=n_elems * itemsize + B * 4,
    )

    # TODO(synk): for B == 1 on v7x, split the spatial-tile axis into a leading size-2
    # "parallel" axis (two independent accumulators) so both TensorCores get work.
    return pl.pallas_call(
        kernel,
        out_shape=jax.ShapeDtypeStruct((B, 1, 1), jnp.float32),
        grid_spec=pltpu.PrefetchScalarGridSpec(
            num_scalar_prefetch=0,
            grid=(num_b, num_j),
            in_specs=[pl.BlockSpec((bt, C, ts), lambda b, j: (b, 0, j))],
            out_specs=pl.BlockSpec((bt, 1, 1), lambda b, j: (b, 0, 0)),
            scratch_shapes=[pltpu.VMEM((bt, 1, ts), jnp.float32)],
        ),
        compiler_params=pltpu.CompilerParams(
            # batch axis parallel (megacore), spatial axis carries the resident accumulator
            dimension_semantics=("parallel", "arbitrary"),
            vmem_limit_bytes=vmem_limit_bytes,
        ),
        cost_estimate=cost,
    )(xr)


# ---------------------------------------------------------------------------
# Logits path: x is (B, C) (i.e. S == 1).  Batch on sublanes, channels on lanes.
# ---------------------------------------------------------------------------
def _hloss_logits_kernel(x_ref, o_ref, *, bt, b_total, need_mask):
    # x_ref: (bt, C) logits — batch rows on sublanes, channels on lanes.
    # o_ref: (bt, 1)  per-row entropy sum.
    x = x_ref[...].astype(jnp.float32)
    m = jnp.max(x, axis=1, keepdims=True)                     # (bt, 1)
    z = x - m
    e = jnp.exp(z)
    s = jnp.sum(e, axis=1, keepdims=True)
    ez = jnp.sum(e * z, axis=1, keepdims=True)
    contrib = ez / s - jnp.log(s)                             # (bt, 1)

    if need_mask:
        row = pl.program_id(0) * bt + jax.lax.broadcasted_iota(jnp.int32, (bt, 1), 0)
        contrib = jnp.where(row < b_total, contrib, 0.0)

    o_ref[...] = contrib


def _hloss_logits(x2d, target_block_bytes, vmem_limit_bytes):
    B, C = (int(d) for d in x2d.shape)
    itemsize = jnp.dtype(x2d.dtype).itemsize

    row_bytes = C * itemsize
    bt = int(max(8, (target_block_bytes // max(row_bytes, 1)) // 8 * 8))
    if bt >= B:
        bt = B                                                # single block; (bt == full dim) is legal
    need_mask = (B % bt) != 0
    num_b = pl.cdiv(B, bt)

    kernel = functools.partial(_hloss_logits_kernel, bt=bt, b_total=B, need_mask=need_mask)

    n_elems = B * C
    cost = pl.CostEstimate(
        flops=8 * n_elems,
        transcendentals=n_elems + B,
        bytes_accessed=n_elems * itemsize + B * 4,
    )

    return pl.pallas_call(
        kernel,
        out_shape=jax.ShapeDtypeStruct((B, 1), jnp.float32),
        grid_spec=pltpu.PrefetchScalarGridSpec(
            num_scalar_prefetch=0,
            grid=(num_b,),
            in_specs=[pl.BlockSpec((bt, C), lambda i: (i, 0))],
            out_specs=pl.BlockSpec((bt, 1), lambda i: (i, 0)),
        ),
        compiler_params=pltpu.CompilerParams(
            dimension_semantics=("parallel",),
            vmem_limit_bytes=vmem_limit_bytes,
        ),
        cost_estimate=cost,
    )(x2d)


# ---------------------------------------------------------------------------
# Public wrapper matching HLoss().forward(x) for x of shape (B, C, ...).
# ---------------------------------------------------------------------------
def hloss(x):
    B = int(x.shape[0])
    C = int(x.shape[1])
    S = int(math.prod(x.shape[2:]))                           # prod of empty tuple == 1
    target_block_bytes, vmem_limit_bytes = _block_budget()

    if S == 1:
        partials = _hloss_logits(x.reshape(B, C), target_block_bytes, vmem_limit_bytes)
    else:
        partials = _hloss_spatial(x.reshape(B, C, S), target_block_bytes, vmem_limit_bytes)

    # Final tiny reduce + (-1/B) scaling on <= B elements: negligible wrapper work.
    return -jnp.sum(partials) / B


def _hloss_ref(x):
    # Pure-JAX reference matching the PyTorch semantics.
    lse = jax.nn.log_softmax(x, axis=1)
    sm = jax.nn.softmax(x, axis=1)
    return -(sm * lse).sum() / x.shape[0]


if __name__ == "__main__":
    key = jax.random.PRNGKey(0)
    k1, k2, k3 = jax.random.split(key, 3)

    tests = [
        jax.random.normal(k1, (2, 4, 16, 16), dtype=jnp.float32),  # NCHW feature map (main path)
        jax.random.normal(k2, (2, 3, 5, 7), dtype=jnp.float32),    # ragged spatial -> mask path
        jax.random.normal(k3, (8, 32), dtype=jnp.float32),         # (B, C) logits -> S==1 path
    ]
    for x in tests:
        out = hloss(x)
        jax.block_until_ready(out)
        ref = _hloss_ref(x)
        assert jnp.allclose(out, ref, rtol=1e-5, atol=1e-5), (x.shape, out, ref)

    print("KERNEL_OK")
</pallas_src>

<mosaic_0001>
module attributes {stable_mosaic.version = 11 : i64} {
  func.func @_hloss_spatial_kernel(%arg0: i32, %arg1: i32, %arg2: memref<2x4x256xf32, #tpu.memory_space<vmem>>, %arg3: memref<2x1x1xf32, #tpu.memory_space<vmem>>, %arg4: memref<2x1x256xf32, #tpu.memory_space<vmem>>) attributes {dimension_semantics = [#tpu.dimension_semantics<parallel>, #tpu.dimension_semantics<arbitrary>], iteration_bounds = array<i64: 1, 1>, scalar_prefetch = 0 : i64, scratch_operands = 1 : i64, tpu.core_type = #tpu.core_type<tc>, window_params = [{transform_indices = @transform_0, window_bounds = array<i64: 2, 4, 256>}, {transform_indices = @transform_1, window_bounds = array<i64: 2, 1, 1>}]} {
    %c0 = arith.constant 0 : index
    %c0_0 = arith.constant 0 : index
    %c0_1 = arith.constant 0 : index
    %0 = vector.load %arg2[%c0, %c0_0, %c0_1] : memref<2x4x256xf32, #tpu.memory_space<vmem>>, vector<2x4x256xf32>
    %cst = arith.constant dense<0xFF800000> : vector<2x256xf32>
    %1 = vector.multi_reduction <maximumf>, %0, %cst [1] : vector<2x4x256xf32> to vector<2x256xf32>
    %2 = vector.shape_cast %1 : vector<2x256xf32> to vector<2x1x256xf32>
    %3 = vector.broadcast %2 : vector<2x1x256xf32> to vector<2x4x256xf32>
    %4 = arith.subf %0, %3 : vector<2x4x256xf32>
    %5 = math.exp %4 : vector<2x4x256xf32>
    %cst_2 = arith.constant dense<0.000000e+00> : vector<2x256xf32>
    %6 = vector.multi_reduction <add>, %5, %cst_2 [1] : vector<2x4x256xf32> to vector<2x256xf32>
    %7 = vector.shape_cast %6 : vector<2x256xf32> to vector<2x1x256xf32>
    %8 = arith.mulf %5, %4 : vector<2x4x256xf32>
    %cst_3 = arith.constant dense<0.000000e+00> : vector<2x256xf32>
    %9 = vector.multi_reduction <add>, %8, %cst_3 [1] : vector<2x4x256xf32> to vector<2x256xf32>
    %10 = vector.shape_cast %9 : vector<2x256xf32> to vector<2x1x256xf32>
    %11 = arith.divf %10, %7 : vector<2x1x256xf32>
    %12 = math.log %7 : vector<2x1x256xf32>
    %13 = arith.subf %11, %12 : vector<2x1x256xf32>
    %cst_4 = arith.constant dense<0.000000e+00> : vector<2x1xf32>
    %14 = vector.multi_reduction <add>, %13, %cst_4 [2] : vector<2x1x256xf32> to vector<2x1xf32>
    %15 = vector.shape_cast %14 : vector<2x1xf32> to vector<2x1x1xf32>
    %c0_5 = arith.constant 0 : index
    %c0_6 = arith.constant 0 : index
    %c0_7 = arith.constant 0 : index
    %16 = vector.load %arg3[%c0_5, %c0_6, %c0_7] : memref<2x1x1xf32, #tpu.memory_space<vmem>>, vector<2x1x1xf32>
    tpu.vector_store %arg3[%c0_5, %c0_6, %c0_7], %15 {strides = array<i32>} : memref<2x1x1xf32, #tpu.memory_space<vmem>>, vector<2x1x1xf32>,
    return
  }
  func.func @transform_0(%arg0: i32, %arg1: i32) -> (i32, i32, i32) {
    %c0_i32 = arith.constant 0 : i32
    %c0_i32_0 = arith.constant 0 : i32
    return %arg0, %c0_i32, %arg1 : i32, i32, i32
  }
  func.func @transform_1(%arg0: i32, %arg1: i32) -> (i32, i32, i32) {
    %c0_i32 = arith.constant 0 : i32
    %c0_i32_0 = arith.constant 0 : i32
    %c0_i32_1 = arith.constant 0 : i32
    return %arg0, %c0_i32, %c0_i32_0 : i32, i32, i32
  }
}

</mosaic_0001>

<bundles_post_ra>
// kernel: tpu_custom_call.1
= control target key start
LH: loop header
LB: loop body
LE: loop exit
PB: predicated region body
PF: predicated region fallthrough
CT: control target
= control target key end

     0   :  { %6 = vsyncpa [#allocation4], 0  ;;  %s224_s6 = smov [#allocation3]   ;;  %s258_s0 = inlined_call_operand.hbm [shape: f32[2,4,256], index: 0, kind: input, shape index: {}]   ;;  %s259_s1 = inlined_call_operand.vmem [shape: f32[2,1,1], index: 1, kind: output, shape index: {}]  }
   0x1   :  { %s12_s7 = sshll.u32 %s224_s6, 4  ;;  %s13_s7 = int_to_ptr.vmem [resolvable:$true] %s12_s7 }
   0x2   :  { %s210_s8 = scalar_lea.vmem %s13_s7, 256  ;;  %p215_p1 = scmp.lt.s32.totalorder %s13_s7, %s13_s7 }
   0x3   :  { %p211_p0 = scmp.ne.s32.totalorder %s13_s7, %s210_s8  ;;  %p216_p2 = scmp.lt.s32.totalorder %s210_s8, %s210_s8 }
   0x5   :  { %p217_p3 = por %p216_p2, %p215_p1 }
   0x7   :  { %p218_p4 = pnand %p217_p3, %p211_p0 }
   0x9   :  { %221 = shalt.err (!%p218_p4)
}
   0xa   :  { %s225_s9 = smov 128   ;;  %s226_s10 = smov 8  }
   0xb   :  { %18 = dma.hbm_to_vmem [thread:$0]  %s258_s0, 256, %s13_s7, [#allocation4], %s225_s9, %s225_s9, %s226_s10  }
   0xc   :  { %222 = dma.done.wait [#allocation4], 256  }
   0xd   :  { %223 = vsyncadd [#allocation4], 4294967040  ;;  %vm30_vm0 = vcmask 1043456   ;;  %v22_v0 = vld [vmem:[#allocation3] sm:$0xff]  ;;  %v23_v1 = vld [vmem:[#allocation3 + $0x8] sm:$0xff]  ;;  %vm169_vm1 = vcmask 0  }
   0xe   :  { %v26_v2 = vcombine.high %v22_v0, %v22_v0  ;;  %v31_v3 = vsel %vm30_vm0, %v22_v0, -inf  ;;  %v27_v4 = vcombine.high %v23_v1, %v23_v1  ;;  %v45_v5 = vsel %vm30_vm0, %v23_v1, -inf }
   0xf   :  { %v32_v6 = vrot.slane %v31_v3, 4  ;;  %v46_v7 = vrot.slane %v45_v5, 4 }
  0x10   :  { %v38_v8 = vsel %vm30_vm0, %v26_v2, -inf  ;;  %v52_v9 = vsel %vm30_vm0, %v27_v4, -inf }
  0x11   :  { %v33_v10 = vmax.f32 %v31_v3, %v32_v6  ;;  %v39_v11 = vrot.slane %v38_v8, 4  ;;  %v47_v12 = vmax.f32 %v45_v5, %v46_v7  ;;  %v53_v13 = vrot.slane %v52_v9, 4 }
  0x13   :  { %v34_v14 = vrot.slane %v33_v10, 2  ;;  %v40_v15 = vmax.f32 %v38_v8, %v39_v11  ;;  %v48_v16 = vrot.slane %v47_v12, 2  ;;  %v54_v17 = vmax.f32 %v52_v9, %v53_v13 }
  0x15   :  { %v35_v18 = vmax.f32 %v33_v10, %v34_v14  ;;  %v41_v19 = vrot.slane %v40_v15, 2  ;;  %v49_v20 = vmax.f32 %v47_v12, %v48_v16  ;;  %v55_v21 = vrot.slane %v54_v17, 2 }
  0x17   :  { %v36_v22 = vrot.slane %v35_v18, 1  ;;  %v42_v23 = vmax.f32 %v40_v15, %v41_v19  ;;  %v50_v24 = vrot.slane %v49_v20, 1  ;;  %v56_v25 = vmax.f32 %v54_v17, %v55_v21 }
  0x19   :  { %v37_v26 = vmax.f32 %v35_v18, %v36_v22  ;;  %v43_v27 = vrot.slane %v42_v23, 1  ;;  %v51_v28 = vmax.f32 %v49_v20, %v50_v24  ;;  %v57_v29 = vrot.slane %v56_v25, 1 }
  0x1b   :  { %v44_v30 = vmax.f32 %v42_v23, %v43_v27  ;;  %v58_v31 = vmax.f32 %v56_v25, %v57_v29 }
  0x1d   :  { %v63_v32 = vcombine.low %v37_v26, %v44_v30  ;;  %v64_v33 = vcombine.low %v51_v28, %v58_v31 }
  0x1f   :  { %v67_v34 = vsub.f32 %v22_v0, %v63_v32  ;;  %v68_v35 = vsub.f32 %v23_v1, %v64_v33 }
  0x21   :  { %v69_v36 = vmul.f32 1.442695, %v67_v34  ;;  %v71_v37 = vmul.f32 1.442695, %v68_v35 }
  0x23   :  { %182 = vpow2.f32 %v69_v36 }
  0x24   :  { %184 = vpow2.f32 %v71_v37 }
  0x30   :  { %v183_v38 = vpop.eup %182 }
  0x31   :  { %v185_v39 = vpop.eup %184  ;;  %v75_v40 = vcombine.high %v183_v38, %v183_v38  ;;  %v79_v41 = vsel %vm30_vm0, %v183_v38, 0.0  ;;  %v107_v42 = vmul.f32 %v183_v38, %v67_v34 }
  0x32   :  { %v80_v43 = vrot.slane %v79_v41, 4  ;;  %v76_v44 = vcombine.high %v185_v39, %v185_v39  ;;  %v93_v45 = vsel %vm30_vm0, %v185_v39, 0.0  ;;  %v108_v46 = vmul.f32 %v185_v39, %v68_v35 }
  0x33   :  { %v86_v47 = vsel %vm30_vm0, %v75_v40, 0.0  ;;  %v111_v48 = vcombine.high %v107_v42, %v107_v42  ;;  %v115_v49 = vsel %vm30_vm0, %v107_v42, 0.0  ;;  %v94_v50 = vrot.slane %v93_v45, 4 }
  0x34   :  { %v81_v51 = vadd.f32 %v80_v43, %v79_v41  ;;  %v87_v52 = vrot.slane %v86_v47, 4  ;;  %v116_v53 = vrot.slane %v115_v49, 4  ;;  %v100_v54 = vsel %vm30_vm0, %v76_v44, 0.0 }
  0x35   :  { %v122_v55 = vsel %vm30_vm0, %v111_v48, 0.0  ;;  %v95_v56 = vadd.f32 %v94_v50, %v93_v45  ;;  %v101_v57 = vrot.slane %v100_v54, 4  ;;  %v112_v58 = vcombine.high %v108_v46, %v108_v46 }
  0x36   :  { %v82_v59 = vrot.slane %v81_v51, 2  ;;  %v88_v60 = vadd.f32 %v87_v52, %v86_v47  ;;  %v123_v61 = vrot.slane %v122_v55, 4  ;;  %v129_v0 = vsel %vm30_vm0, %v108_v46, 0.0 }
  0x37   :  { %v96_v62 = vrot.slane %v95_v56, 2  ;;  %v102_v63 = vadd.f32 %v101_v57, %v100_v54  ;;  %v136_v1 = vsel %vm30_vm0, %v112_v58, 0.0  ;;  %v117_v4 = vadd.f32 %v116_v53, %v115_v49 }
  0x38   :  { %v83_v2 = vadd.f32 %v82_v59, %v81_v51  ;;  %v89_v3 = vrot.slane %v88_v60, 2  ;;  %v130_v7 = vrot.slane %v129_v0, 4  ;;  %v137_v8 = vrot.slane %v136_v1, 4 }
  0x39   :  { %v97_v5 = vadd.f32 %v96_v62, %v95_v56  ;;  %v103_v6 = vrot.slane %v102_v63, 2  ;;  %v124_v11 = vadd.f32 %v123_v61, %v122_v55  ;;  %v118_v16 = vrot.slane %v117_v4, 2 }
  0x3a   :  { %v84_v9 = vrot.slane %v83_v2, 1  ;;  %v90_v10 = vadd.f32 %v89_v3, %v88_v60  ;;  %v131_v17 = vadd.f32 %v130_v7, %v129_v0  ;;  %v138_v19 = vadd.f32 %v137_v8, %v136_v1 }
  0x3b   :  { %v98_v12 = vrot.slane %v97_v5, 1  ;;  %v104_v13 = vadd.f32 %v103_v6, %v102_v63  ;;  %v125_v21 = vrot.slane %v124_v11, 2  ;;  %v119_v24 = vadd.f32 %v118_v16, %v117_v4 }
  0x3c   :  { %v85_v14 = vadd.f32 %v84_v9, %v83_v2  ;;  %v91_v15 = vrot.slane %v90_v10, 1  ;;  %v132_v25 = vrot.slane %v131_v17, 2  ;;  %v139_v26 = vrot.slane %v138_v19, 2 }
  0x3d   :  { %v105_v18 = vrot.slane %v104_v13, 1  ;;  %v99_v22 = vadd.f32 %v98_v12, %v97_v5  ;;  %v126_v27 = vadd.f32 %v125_v21, %v124_v11  ;;  %v120_v28 = vrot.slane %v119_v24, 1 }
  0x3e   :  { %v92_v20 = vadd.f32 %v91_v15, %v90_v10  ;;  %186 = vrcp.f32 %v85_v14  ;;  %v133_v29 = vadd.f32 %v132_v25, %v131_v17  ;;  %v140_v30 = vadd.f32 %v139_v26, %v138_v19 }
  0x3f   :  { %188 = vlog2.f32 %v85_v14  ;;  %v106_v23 = vadd.f32 %v105_v18, %v104_v13  ;;  %v127_v31 = vrot.slane %v126_v27, 1  ;;  %v121_v32 = vadd.f32 %v120_v28, %v119_v24 }
  0x40   :  { %190 = vrcp.f32 %v92_v20  ;;  %v134_v33 = vrot.slane %v133_v29, 1  ;;  %v141_v34 = vrot.slane %v140_v30, 1 }
  0x41   :  { %192 = vlog2.f32 %v92_v20  ;;  %v128_v35 = vadd.f32 %v127_v31, %v126_v27 }
  0x42   :  { %194 = vrcp.f32 %v99_v22  ;;  %v135_v39 = vadd.f32 %v134_v33, %v133_v29  ;;  %v142_v42 = vadd.f32 %v141_v34, %v140_v30 }
  0x43   :  { %196 = vrcp.f32 %v106_v23 }
  0x44   :  { %198 = vlog2.f32 %v99_v22 }
  0x45   :  { %200 = vlog2.f32 %v106_v23 }
  0x4b   :  { %v187_v36 = vpop.eup %186 }
  0x4c   :  { %v189_v37 = vpop.eup %188  ;;  %v144_v38 = vmul.f32 %v187_v36, %v121_v32 }
  0x4d   :  { %v191_v40 = vpop.eup %190  ;;  %v152_v41 = vmul.f32 0.6931472, %v189_v37 }
  0x4e   :  { %v193_v43 = vpop.eup %192  ;;  %v146_v44 = vmul.f32 %v191_v40, %v128_v35 }
  0x4f   :  { %v195_v45 = vpop.eup %194  ;;  %v154_v46 = vmul.f32 0.6931472, %v193_v43  ;;  %v159_v47 = vsub.f32 %v144_v38, %v152_v41 }
  0x50   :  { %v197_v48 = vpop.eup %196  ;;  %v148_v49 = vmul.f32 %v195_v45, %v135_v39 }
  0x51   :  { %v199_v50 = vpop.eup %198  ;;  %v160_v51 = vsub.f32 %v146_v44, %v154_v46  ;;  %v150_v52 = vmul.f32 %v197_v48, %v142_v42 }
  0x52   :  { %v201_v53 = vpop.eup %200  ;;  %v156_v54 = vmul.f32 0.6931472, %v199_v50 }
  0x53   :  { %v163_v55 = vadd.f32 %v160_v51, %v159_v47  ;;  %v158_v56 = vmul.f32 0.6931472, %v201_v53 }
  0x54   :  { %v161_v57 = vsub.f32 %v148_v49, %v156_v54 }
  0x55   :  { %164 = vadd.xlane.f32.xlu0 %v163_v55  ;;  %v162_v58 = vsub.f32 %v150_v52, %v158_v56 }
  0x57   :  { %v166_v59 = vadd.f32 %v162_v58, %v161_v57 }
  0x59   :  { %167 = vadd.xlane.f32.xlu0 %v166_v59 }
  0xde   :  { %v165_v60 = vpop.xlane.xlu0 %164 }
  0xdf   :  { %170 = vst.msk [vmem:[%s259_s1] sm:$0x1] %vm169_vm1, %v165_v60 }
  0xe2   :  { %v168_v61 = vpop.xlane.xlu0 %167 }
  0xe3   :  { %171 = vst.msk [vmem:[%s259_s1 + $0x1] sm:$0x1] %vm169_vm1, %v168_v61 }
  0xe4   :  { %176 = vsyncpa [#allocation4], 1 }

</bundles_post_ra>
